<compile_context>
chip_gen: v7x
topology: tpu7x:2x2x1
jax: 0.10.0
libtpu: 0.0.40
codegen_flags: <defaults>
</compile_context>

<pallas_src>
import jax
import jax.numpy as jnp
from jax.experimental import pallas as pl
from jax.experimental.pallas import tpu as pltpu


def _softmax_dim0_kernel(x_ref, o_ref):
    # One (N, TILE_D) column strip per grid step: max-reduce over axis 0,
    # subtract, exp (EUP), sum-reduce over axis 0, reciprocal (EUP) + multiply.
    x = x_ref[...]
    if x.dtype != jnp.float32:
        x = x.astype(jnp.float32)  # keep reductions/exp in f32 for bf16 inputs
    x_max = jnp.max(x, axis=0, keepdims=True)           # (1, TILE_D)
    x_exp = jnp.exp(x - x_max)                          # (N, TILE_D)
    partition = jnp.sum(x_exp, axis=0, keepdims=True)   # (1, TILE_D)
    inv = pl.reciprocal(partition, approx=True)         # EUP, nearly free
    o_ref[...] = (x_exp * inv).astype(o_ref.dtype)


def _round_up(v: int, m: int) -> int:
    return (v + m - 1) // m * m


def softmax_stable(x: jax.Array) -> jax.Array:
    """Stable softmax over dim 0 of a 2-D (N, D) array via a Pallas TPU kernel."""
    assert x.ndim == 2, "kernel expects a 2-D (N, D) input"
    n, d = x.shape

    # --- choose a lane-dense tile along D -----------------------------------
    # Per-tile VMEM working set (bytes per column of the strip):
    #   2 double-buffered input bufs + 2 output bufs + two f32 temps (x, x_exp)
    in_bytes = jnp.dtype(x.dtype).itemsize
    out_bytes = in_bytes
    per_col_bytes = n * (2 * in_bytes + 2 * out_bytes + 2 * 4)
    vmem_budget = 8 * 1024 * 1024  # conservative: fits default scoped VMEM on all gens
    max_tile_by_vmem = max(128, (vmem_budget // max(per_col_bytes, 1)) // 128 * 128)
    tile_d = min(512, _round_up(d, 128), max_tile_by_vmem)

    # Pad D so it divides evenly into lane-dense tiles (padded columns are
    # independent garbage and are sliced off below).
    d_pad = _round_up(d, tile_d)
    x_in = x if d_pad == d else jnp.pad(x, ((0, 0), (0, d_pad - d)))

    grid = (d_pad // tile_d,)
    out = pl.pallas_call(
        _softmax_dim0_kernel,
        out_shape=jax.ShapeDtypeStruct((n, d_pad), x.dtype),
        grid=grid,
        in_specs=[pl.BlockSpec((n, tile_d), lambda j: (0, j))],
        out_specs=pl.BlockSpec((n, tile_d), lambda j: (0, j)),
        compiler_params=pltpu.CompilerParams(
            dimension_semantics=("parallel",),  # D tiles are independent
        ),
    )(x_in)

    if d_pad != d:
        out = out[:, :d]
    return out


if __name__ == "__main__":
    key = jax.random.PRNGKey(0)
    # Small shape consistent with the module: seq=8, hidden=32, softmax over seq (dim 0).
    x = jax.random.normal(key, (8, 32), dtype=jnp.float32)

    out = softmax_stable(x)
    jax.block_until_ready(out)

    # Reference check against jax.nn.softmax along axis 0.
    # (Tolerance accounts for the approximate EUP reciprocal.)
    ref = jax.nn.softmax(x, axis=0)
    assert out.shape == x.shape and out.dtype == x.dtype
    assert jnp.allclose(out, ref, atol=1e-3, rtol=1e-3)

    print("KERNEL_OK")
</pallas_src>

<mosaic_0001>
module attributes {stable_mosaic.version = 11 : i64} {
  func.func @_softmax_dim0_kernel(%arg0: i32, %arg1: memref<8x128xf32, #tpu.memory_space<vmem>>, %arg2: memref<8x128xf32, #tpu.memory_space<vmem>>) attributes {dimension_semantics = [#tpu.dimension_semantics<parallel>], iteration_bounds = array<i64: 1>, scalar_prefetch = 0 : i64, scratch_operands = 0 : i64, tpu.core_type = #tpu.core_type<tc>, window_params = [{transform_indices = @transform_0, window_bounds = array<i64: 8, 128>}, {transform_indices = @transform_1, window_bounds = array<i64: 8, 128>}]} {
    %c0 = arith.constant 0 : index
    %c0_0 = arith.constant 0 : index
    %0 = vector.load %arg1[%c0, %c0_0] : memref<8x128xf32, #tpu.memory_space<vmem>>, vector<8x128xf32>
    %cst = arith.constant dense<0xFF800000> : vector<128xf32>
    %1 = vector.multi_reduction <maximumf>, %0, %cst [0] : vector<8x128xf32> to vector<128xf32>
    %2 = vector.shape_cast %1 : vector<128xf32> to vector<1x128xf32>
    %3 = vector.broadcast %2 : vector<1x128xf32> to vector<8x128xf32>
    %4 = arith.subf %0, %3 : vector<8x128xf32>
    %5 = math.exp %4 : vector<8x128xf32>
    %cst_1 = arith.constant dense<0.000000e+00> : vector<128xf32>
    %6 = vector.multi_reduction <add>, %5, %cst_1 [0] : vector<8x128xf32> to vector<128xf32>
    %7 = vector.shape_cast %6 : vector<128xf32> to vector<1x128xf32>
    %8 = tpu.reciprocal %7 {approx = true} : vector<1x128xf32> -> vector<1x128xf32>
    %9 = vector.broadcast %8 : vector<1x128xf32> to vector<8x128xf32>
    %10 = arith.mulf %5, %9 : vector<8x128xf32>
    %c0_2 = arith.constant 0 : index
    %c0_3 = arith.constant 0 : index
    %11 = vector.load %arg2[%c0_2, %c0_3] : memref<8x128xf32, #tpu.memory_space<vmem>>, vector<8x128xf32>
    tpu.vector_store %arg2[%c0_2, %c0_3], %10 {strides = array<i32>} : memref<8x128xf32, #tpu.memory_space<vmem>>, vector<8x128xf32>,
    return
  }
  func.func @transform_0(%arg0: i32) -> (i32, i32) {
    %c0_i32 = arith.constant 0 : i32
    %c0_i32_0 = arith.constant 0 : i32
    return %c0_i32, %arg0 : i32, i32
  }
  func.func @transform_1(%arg0: i32) -> (i32, i32) {
    %c0_i32 = arith.constant 0 : i32
    %c0_i32_0 = arith.constant 0 : i32
    return %c0_i32, %arg0 : i32, i32
  }
}

</mosaic_0001>

<bundles_post_ra>
// kernel: tpu_custom_call.1
= control target key start
LH: loop header
LB: loop body
LE: loop exit
PB: predicated region body
PF: predicated region fallthrough
CT: control target
= control target key end

     0   :  { %6 = vsyncpa [#allocation3], 0  ;;  %s145_s0 = inlined_call_operand.hbm [shape: f32[8,128], index: 0, kind: input, shape index: {}]   ;;  %s146_s1 = inlined_call_operand.hbm [shape: f32[8,128], index: 1, kind: output, shape index: {}]  }
   0x1   :  { %7 = vsyncpa [#allocation4], 0  ;;  %s109_s6 = smov [#allocation2]   ;;  %s61_s10 = scalar_lea.hbm %s145_s0, 128 }
   0x2   :  { %s14_s7 = sshll.u32 %s109_s6, 4  ;;  %p62_p0 = scmp.ne.s32.totalorder %s145_s0, %s61_s10  ;;  %s15_s7 = int_to_ptr.vmem [resolvable:$true] %s14_s7 }
   0x3   :  { %p65_p1 = scmp.lt.u32.totalorder %s61_s10, %s145_s0 }
   0x5   :  { %p67_p2 = pnand %p65_p1, %p62_p0 }
   0x7   :  { %70 = shalt.err (!%p67_p2)
}
   0x8   :  { %s71_s15 = scalar_lea.vmem %s15_s7, 128  ;;  %p76_p4 = scmp.lt.s32.totalorder %s15_s7, %s15_s7 }
   0x9   :  { %p72_p3 = scmp.ne.s32.totalorder %s15_s7, %s71_s15  ;;  %p77_p5 = scmp.lt.s32.totalorder %s71_s15, %s71_s15 }
   0xb   :  { %p78_p6 = por %p77_p5, %p76_p4 }
   0xd   :  { %p79_p7 = pnand %p78_p6, %p72_p3 }
   0xf   :  { %82 = shalt.err (!%p79_p7)
}
  0x10   :  { %17 = dma.hbm_to_vmem [thread:$0]  %s145_s0, 128, %s15_s7, [#allocation3]  }
  0x11   :  { %105 = dma.done.wait [#allocation3], 128  }
  0x12   :  { %106 = vsyncadd [#allocation3], 4294967168  ;;  %v21_v0 = vld [vmem:[#allocation2] sm:$0xff]  ;;  %s110_s0 = smov [#allocation5]  }
  0x13   :  { %v22_v1 = vrot.slane %v21_v0, 4  ;;  %s46_s18 = sshll.u32 %s110_s0, 4  ;;  %s47_s18 = int_to_ptr.vmem [resolvable:$true] %s46_s18 }
  0x14   :  { %s83_s19 = scalar_lea.vmem %s47_s18, 128  ;;  %p88_p9 = scmp.lt.s32.totalorder %s47_s18, %s47_s18 }
  0x15   :  { %v23_v2 = vmax.f32 %v21_v0, %v22_v1  ;;  %p84_p8 = scmp.ne.s32.totalorder %s47_s18, %s83_s19  ;;  %p89_p10 = scmp.lt.s32.totalorder %s83_s19, %s83_s19 }
  0x17   :  { %v24_v3 = vrot.slane %v23_v2, 2  ;;  %p90_p11 = por %p89_p10, %p88_p9 }
  0x19   :  { %v25_v4 = vmax.f32 %v23_v2, %v24_v3  ;;  %p91_p12 = pnand %p90_p11, %p84_p8 }
  0x1b   :  { %v26_v5 = vrot.slane %v25_v4, 1 }
  0x1d   :  { %v27_v6 = vmax.f32 %v25_v4, %v26_v5 }
  0x1f   :  { %v28_v7 = vsub.f32 %v21_v0, %v27_v6 }
  0x21   :  { %v29_v8 = vmul.f32 1.442695, %v28_v7 }
  0x23   :  { %57 = vpow2.f32 %v29_v8 }
  0x2d   :  { %v58_v9 = vpop.eup %57 }
  0x2e   :  { %v31_v10 = vrot.slane %v58_v9, 4 }
  0x30   :  { %v32_v11 = vadd.f32 %v58_v9, %v31_v10 }
  0x32   :  { %v33_v12 = vrot.slane %v32_v11, 2 }
  0x34   :  { %v34_v13 = vadd.f32 %v33_v12, %v32_v11 }
  0x36   :  { %v35_v14 = vrot.slane %v34_v13, 1 }
  0x38   :  { %v36_v15 = vadd.f32 %v35_v14, %v34_v13 }
  0x3a   :  { %59 = vrcp.f32 %v36_v15 }
  0x44   :  { %v60_v16 = vpop.eup %59 }
  0x45   :  { %v38_v17 = vmul.f32 %v60_v16, %v58_v9 }
  0x47   :  { %39 = vst [vmem:[#allocation5] sm:$0xff] %v38_v17 }
  0x48   :  { %94 = shalt.err (!%p91_p12)
}
  0x49   :  { %s95_s22 = scalar_lea.hbm %s146_s1, 128 }
  0x4a   :  { %p96_p13 = scmp.ne.s32.totalorder %s146_s1, %s95_s22  ;;  %p99_p0 = scmp.lt.u32.totalorder %s95_s22, %s146_s1 }
  0x4c   :  { %p101_p1 = pnand %p99_p0, %p96_p13 }
  0x4e   :  { %104 = shalt.err (!%p101_p1)
}
  0x4f   :  { %49 = dma.vmem_to_hbm [thread:$0]  %s47_s18, 128, %s146_s1, [#allocation4]  }
  0x50   :  { %107 = dma.done.wait [#allocation4], 128  }
  0x51   :  { %108 = vsyncadd [#allocation4], 4294967168 }
  0x52   :  { %53 = vsyncpa [#allocation3], 1 }
  0x53   :  { %54 = vsyncpa [#allocation4], 1 }

</bundles_post_ra>
